<compile_context>
chip_gen: v7x
topology: tpu7x:2x2x1
jax: 0.10.0
libtpu: 0.0.40
codegen_flags: <defaults>
</compile_context>

<pallas_src>
import functools
import math

import jax
import jax.numpy as jnp
from jax import lax
from jax.experimental import pallas as pl
from jax.experimental.pallas import tpu as pltpu


def _round_up(x, m):
    return ((x + m - 1) // m) * m


# ----------------------------------------------------------------------------
# Kernel
# ----------------------------------------------------------------------------
def _cross_fusion_kernel(kv_len_ref,                      # scalar prefetch: (L,) int32 (SMEM)
                         q0_ref, kvh_ref,
                         wq_ref, bq_ref, wo_ref, bo_ref,
                         o_ref,
                         q_scr,
                         *, n_head, head_dim, needs_mask):
    layer = pl.program_id(2)
    n_layers = pl.num_programs(2)

    # Load q once per (batch, seq-tile); it stays resident across layers.
    @pl.when(layer == 0)
    def _():
        q_scr[...] = q0_ref[...].astype(jnp.float32)

    q = q_scr[...]                                        # (tq, H) f32

    # ---- Q projection: one lane-dense (tq,H)@(H,H) bf16 matmul.
    #      1/sqrt(head_dim) is folded into wq/bq (zero in-kernel cost).
    Q = jnp.dot(q.astype(jnp.bfloat16), wq_ref[layer],
                preferred_element_type=jnp.float32) + bq_ref[layer]   # (tq,H) f32

    kv_base = layer * (2 * n_head)                        # flat index into K/V stack
    acc = None
    for h in range(n_head):                               # static unroll over heads
        q_h = Q[:, h * head_dim:(h + 1) * head_dim].astype(jnp.bfloat16)  # (tq,hd)
        k_h = kvh_ref[kv_base + h]                        # (skv, hd) bf16 (precomputed)
        v_h = kvh_ref[kv_base + n_head + h]               # (skv, hd) bf16 (precomputed)

        # scores: contract head_dim of both operands (no K transpose materialized)
        s = lax.dot_general(q_h, k_h, (((1,), (1,)), ((), ())),
                            preferred_element_type=jnp.float32)       # (tq, skv)
        if needs_mask:
            kpos = lax.broadcasted_iota(jnp.int32, s.shape, 1)
            s = jnp.where(kpos < kv_len_ref[layer], s, -1e30)

        # softmax over keys, f32 math, exact reciprocal (EUP is not the bottleneck).
        # Note: a fully-masked row yields p == 1 everywhere (s - m == 0), so the
        # denominator never vanishes.
        m = jnp.max(s, axis=-1, keepdims=True)
        p = jnp.exp(s - m)
        p = p / jnp.sum(p, axis=-1, keepdims=True)

        ctx = jnp.dot(p.astype(jnp.bfloat16), v_h,
                      preferred_element_type=jnp.float32)             # (tq, hd)

        # per-head output projection, lane-dense H output, accumulated in f32
        part = jnp.dot(ctx.astype(jnp.bfloat16), wo_ref[layer * n_head + h],
                       preferred_element_type=jnp.float32)            # (tq, H)
        acc = part if acc is None else acc + part

    new_q = acc + bo_ref[layer]                           # (tq, H) f32
    q_scr[...] = new_q

    @pl.when(layer == n_layers - 1)
    def _():
        o_ref[...] = new_q.astype(o_ref.dtype)


# ----------------------------------------------------------------------------
# Parameter init (logical layout, f32) and packing / hoisted K-V projection
# ----------------------------------------------------------------------------
def init_cross_attention_params(key, hidden_size):
    keys = jax.random.split(key, 8)
    scale = 1.0 / math.sqrt(hidden_size)

    def w(k):
        return jax.random.normal(k, (hidden_size, hidden_size), jnp.float32) * scale

    def b(k):
        return jax.random.normal(k, (1, hidden_size), jnp.float32) * 0.01

    return {
        "wq": w(keys[0]), "bq": b(keys[1]),
        "wk": w(keys[2]), "bk": b(keys[3]),
        "wv": w(keys[4]), "bv": b(keys[5]),
        "wo": w(keys[6]), "bo": b(keys[7]),
    }


def pack_cross_fusion_params(layer_params, n_head, w_dtype=jnp.bfloat16):
    """Layer-stacked, bf16 weights for the kernel; 1/sqrt(hd) folded into wq/bq."""
    H = layer_params[0]["wq"].shape[0]
    hd = H // n_head
    scale = 1.0 / math.sqrt(hd)
    wq_l, bq_l, wo_l, bo_l = [], [], [], []
    for p in layer_params:
        wq_l.append((p["wq"] * scale).astype(w_dtype))            # (H, H)
        bq_l.append((p["bq"] * scale).astype(jnp.float32))        # (1, H)
        wo_l.append(p["wo"].reshape(n_head, hd, H).astype(w_dtype))
        bo_l.append(p["bo"].astype(jnp.float32))
    L = len(layer_params)
    return {
        "wq": jnp.stack(wq_l),                                    # (L, H, H) bf16
        "bq": jnp.stack(bq_l),                                    # (L, 1, H) f32
        "wo": jnp.stack(wo_l).reshape(L * n_head, hd, H),         # (L*n_head, hd, H) bf16
        "bo": jnp.stack(bo_l),                                    # (L, 1, H) f32
    }


def precompute_kv_heads(kv_list, layer_params, n_head, skv_pad, dtype=jnp.bfloat16):
    """Hoisted K/V projection (+bias, head split), done once per (layer, batch).

    Returns (B, L*2*n_head, skv_pad, head_dim) bf16 where, for layer l and
    head h, index l*2*n_head + h is K and l*2*n_head + n_head + h is V.
    """
    B, _, H = kv_list[0].shape
    hd = H // n_head
    per_layer = []
    for kv, p in zip(kv_list, layer_params):
        skv = kv.shape[1]
        K = kv @ p["wk"] + p["bk"]                                # (B, skv, H)
        V = kv @ p["wv"] + p["bv"]
        KV = jnp.concatenate([K, V], axis=-1)                     # (B, skv, 2H)
        KV = KV.reshape(B, skv, 2 * n_head, hd).transpose(0, 2, 1, 3)  # (B, 2n, skv, hd)
        KV = jnp.pad(KV, ((0, 0), (0, 0), (0, skv_pad - skv), (0, 0)))
        per_layer.append(KV)
    kvh = jnp.stack(per_layer, axis=1)                            # (B, L, 2n, skv_pad, hd)
    return kvh.reshape(B, len(kv_list) * 2 * n_head, skv_pad, hd).astype(dtype)


# ----------------------------------------------------------------------------
# Wrapper: the whole CrossFusion forward in one pallas_call
# ----------------------------------------------------------------------------
def cross_fusion_forward(model_output_list, layer_params, *, n_head):
    q0 = model_output_list[0]
    kv_list = list(model_output_list[1:])
    n_layers = len(kv_list)
    assert n_layers >= 1 and len(layer_params) == n_layers

    B, Sq, H = q0.shape
    assert H % n_head == 0, "hidden_size must be divisible by n_head"
    hd = H // n_head

    # VMEM capacity drives tile cap and the scoped limit (v7x: 64 MiB/TC,
    # v5e/v6e: 128 MiB).
    try:
        vmem_cap = int(pltpu.get_tpu_info().vmem_capacity_bytes)
    except Exception:
        vmem_cap = 64 * 2 ** 20

    # q-sequence tiling: pad Sq up to a multiple of the tile (no divisor cliff;
    # multiple of 16 also satisfies bf16 sublane packing).
    tq_cap = 512 if vmem_cap >= 96 * 2 ** 20 else 256
    tq = min(_round_up(Sq, 16), tq_cap)
    sq_pad = _round_up(Sq, tq)
    n_tiles = sq_pad // tq
    q0_p = q0 if sq_pad == Sq else jnp.pad(q0, ((0, 0), (0, sq_pad - Sq), (0, 0)))

    # k/v: pad every layer's source to a common key length; mask in-kernel.
    kv_lens = [int(kv.shape[1]) for kv in kv_list]
    skv_pad = _round_up(max(kv_lens), 8)
    needs_mask = any(l != skv_pad for l in kv_lens)
    kv_len_arr = jnp.asarray(kv_lens, dtype=jnp.int32)

    kvh = precompute_kv_heads(kv_list, layer_params, n_head, skv_pad)
    packed = pack_cross_fusion_params(layer_params, n_head)

    grid = (B, n_tiles, n_layers)                     # layer axis innermost -> q resident
    l2n = n_layers * 2 * n_head

    kernel = functools.partial(_cross_fusion_kernel, n_head=n_head,
                               head_dim=hd, needs_mask=needs_mask)

    in_specs = [
        # q tile for this (batch, seq-tile)
        pl.BlockSpec((None, tq, H), lambda b, t, l, lens: (b, t, 0)),
        # precomputed K/V head stack: index depends only on b -> VMEM-resident
        # across (tile, layer), re-fetched only when the batch changes.
        pl.BlockSpec((None, l2n, skv_pad, hd), lambda b, t, l, lens: (b, 0, 0, 0)),
        # layer-stacked weights: constant index map -> DMA'd from HBM exactly once.
        pl.BlockSpec((n_layers, H, H), lambda b, t, l, lens: (0, 0, 0)),            # wq
        pl.BlockSpec((n_layers, 1, H), lambda b, t, l, lens: (0, 0, 0)),            # bq
        pl.BlockSpec((n_layers * n_head, hd, H), lambda b, t, l, lens: (0, 0, 0)),  # wo
        pl.BlockSpec((n_layers, 1, H), lambda b, t, l, lens: (0, 0, 0)),            # bo
    ]
    out_spec = pl.BlockSpec((None, tq, H), lambda b, t, l, lens: (b, t, 0))

    # VMEM budget: resident weights + per-batch K/V stack (x2 buffers), q/out
    # blocks (x2 double-buffer), f32 q scratch, and per-step temporaries.
    resident = (packed["wq"].nbytes + packed["bq"].nbytes + packed["wo"].nbytes
                + packed["bo"].nbytes + kvh.nbytes // B)
    blocks = 2 * tq * H * q0.dtype.itemsize
    temps = 6 * tq * max(H, skv_pad) * 4
    need = 2 * resident + 2 * blocks + tq * H * 4 + temps
    vmem_limit = int(min(int(0.8 * vmem_cap), max(32 * 2 ** 20, 2 * need)))

    flops = int(B * n_layers * sq_pad * (4 * H * H + 4 * skv_pad * H))
    transcendentals = int(B * n_layers * n_head * sq_pad * skv_pad)
    bytes_accessed = int(2 * q0_p.nbytes + kvh.nbytes
                         + sum(int(v.nbytes) for v in packed.values()))

    out = pl.pallas_call(
        kernel,
        out_shape=jax.ShapeDtypeStruct((B, sq_pad, H), q0.dtype),
        grid_spec=pltpu.PrefetchScalarGridSpec(
            num_scalar_prefetch=1,
            grid=grid,
            in_specs=in_specs,
            out_specs=out_spec,
            scratch_shapes=[pltpu.VMEM((tq, H), jnp.float32)],
        ),
        compiler_params=pltpu.CompilerParams(
            # batch/tile axes parallel (v7x megacore shards them); the layer
            # axis must stay sequential so the resident q scratch is correct.
            dimension_semantics=("parallel", "parallel", "arbitrary"),
            vmem_limit_bytes=vmem_limit),
        cost_estimate=pl.CostEstimate(flops=flops,
                                      transcendentals=transcendentals,
                                      bytes_accessed=bytes_accessed),
    )(kv_len_arr, q0_p, kvh,
      packed["wq"], packed["bq"], packed["wo"], packed["bo"])

    return out[:, :Sq] if sq_pad != Sq else out


# ----------------------------------------------------------------------------
# Pure-JAX reference (f32, logical per-layer params)
# ----------------------------------------------------------------------------
def _cross_attention_ref(q, kv, params, n_head):
    B, Sq, H = q.shape
    hd = H // n_head
    Q = q @ params["wq"] + params["bq"]
    K = kv @ params["wk"] + params["bk"]
    V = kv @ params["wv"] + params["bv"]
    Q = Q.reshape(B, Sq, n_head, hd).transpose(0, 2, 1, 3)
    K = K.reshape(B, -1, n_head, hd).transpose(0, 2, 1, 3)
    V = V.reshape(B, -1, n_head, hd).transpose(0, 2, 1, 3)
    s = jnp.einsum("bhqd,bhkd->bhqk", Q, K) / math.sqrt(hd)
    p = jax.nn.softmax(s, axis=-1)
    ctx = jnp.einsum("bhqk,bhkd->bhqd", p, V)
    ctx = ctx.transpose(0, 2, 1, 3).reshape(B, Sq, H)
    return ctx @ params["wo"] + params["bo"]


if __name__ == "__main__":
    # Small shapes consistent with the module's constructor args.
    n_head = 4
    num_model = 3
    seq_list = [8, 8, 8]        # q_seq_len followed by k/v seq lens
    hidden_size = 32
    batch = 2

    root = jax.random.PRNGKey(0)
    k_in, k_par = jax.random.split(root)

    in_keys = jax.random.split(k_in, num_model)
    model_output_list = [
        jax.random.normal(in_keys[i], (batch, seq_list[i], hidden_size), jnp.float32)
        for i in range(num_model)
    ]

    par_keys = jax.random.split(k_par, num_model - 1)
    layer_params = [init_cross_attention_params(par_keys[i], hidden_size)
                    for i in range(num_model - 1)]

    out = cross_fusion_forward(model_output_list, layer_params, n_head=n_head)
    out = jax.block_until_ready(out)

    ref = model_output_list[0]
    for i, params in enumerate(layer_params):
        ref = _cross_attention_ref(ref, model_output_list[i + 1], params, n_head)
    assert out.shape == (batch, seq_list[0], hidden_size)
    # Tolerance reflects bf16 MXU inputs (weights / K / V / probs are fed in
    # bf16 with f32 accumulation, per the performance review); the f32
    # reference therefore differs at the ~1e-2 level after two layers.
    assert jnp.allclose(out, ref, atol=5e-2, rtol=5e-2), \
        float(jnp.max(jnp.abs(out - ref)))

    print("KERNEL_OK")
</pallas_src>

<mosaic_0001>
module attributes {stable_mosaic.version = 11 : i64} {
  func.func @_cross_fusion_kernel(%arg0: i32, %arg1: i32, %arg2: i32, %arg3: memref<2xi32, #tpu.memory_space<smem>>, %arg4: memref<1x16x32xf32, #tpu.memory_space<vmem>>, %arg5: memref<1x16x8x8xbf16, #tpu.memory_space<vmem>>, %arg6: memref<2x32x32xbf16, #tpu.memory_space<vmem>>, %arg7: memref<2x1x32xf32, #tpu.memory_space<vmem>>, %arg8: memref<8x8x32xbf16, #tpu.memory_space<vmem>>, %arg9: memref<2x1x32xf32, #tpu.memory_space<vmem>>, %arg10: memref<1x16x32xf32, #tpu.memory_space<vmem>>, %arg11: memref<16x32xf32, #tpu.memory_space<vmem>>) attributes {dimension_semantics = [#tpu.dimension_semantics<parallel>, #tpu.dimension_semantics<parallel>, #tpu.dimension_semantics<arbitrary>], iteration_bounds = array<i64: 2, 1, 2>, scalar_prefetch = 1 : i64, scratch_operands = 1 : i64, tpu.core_type = #tpu.core_type<tc>, window_params = [{transform_indices = @transform_0, window_bounds = array<i64: 1, 16, 32>}, {transform_indices = @transform_1, window_bounds = array<i64: 1, 16, 8, 8>}, {pipeline_mode = #tpu.pipeline_mode<synchronous>, transform_indices = @transform_2, window_bounds = array<i64: 2, 32, 32>}, {pipeline_mode = #tpu.pipeline_mode<synchronous>, transform_indices = @transform_3, window_bounds = array<i64: 2, 1, 32>}, {pipeline_mode = #tpu.pipeline_mode<synchronous>, transform_indices = @transform_4, window_bounds = array<i64: 8, 8, 32>}, {pipeline_mode = #tpu.pipeline_mode<synchronous>, transform_indices = @transform_5, window_bounds = array<i64: 2, 1, 32>}, {transform_indices = @transform_6, window_bounds = array<i64: 1, 16, 32>}]} {
    %c0_i32 = arith.constant 0 : i32
    %0 = arith.cmpi eq, %arg2, %c0_i32 : i32
    %1 = arith.extui %0 : i1 to i32
    %c0_i32_0 = arith.constant 0 : i32
    %2 = arith.cmpi ne, %1, %c0_i32_0 : i32
    scf.if %2 {
      %c0_80 = arith.constant 0 : index
      %c0_81 = arith.constant 0 : index
      %c0_82 = arith.constant 0 : index
      %147 = vector.load %arg4[%c0_80, %c0_81, %c0_82] : memref<1x16x32xf32, #tpu.memory_space<vmem>>, vector<1x16x32xf32>
      %148 = vector.shape_cast %147 : vector<1x16x32xf32> to vector<16x32xf32>
      %c0_83 = arith.constant 0 : index
      %c0_84 = arith.constant 0 : index
      %149 = vector.load %arg11[%c0_83, %c0_84] : memref<16x32xf32, #tpu.memory_space<vmem>>, vector<16x32xf32>
      tpu.vector_store %arg11[%c0_83, %c0_84], %148 {strides = array<i32>} : memref<16x32xf32, #tpu.memory_space<vmem>>, vector<16x32xf32>,
    } else {
    }
    %c0 = arith.constant 0 : index
    %c0_1 = arith.constant 0 : index
    %3 = vector.load %arg11[%c0, %c0_1] : memref<16x32xf32, #tpu.memory_space<vmem>>, vector<16x32xf32>
    %4 = arith.truncf %3 : vector<16x32xf32> to vector<16x32xbf16>
    %5 = arith.index_cast %arg2 : i32 to index
    %c0_2 = arith.constant 0 : index
    %c0_3 = arith.constant 0 : index
    %6 = vector.load %arg6[%5, %c0_2, %c0_3] : memref<2x32x32xbf16, #tpu.memory_space<vmem>>, vector<1x32x32xbf16>
    %7 = vector.shape_cast %6 : vector<1x32x32xbf16> to vector<32x32xbf16>
    %cst = arith.constant dense<0.000000e+00> : vector<16x32xf32>
    %8 = tpu.matmul %4, %7, %cst {dimension_numbers = #tpu.dot_dimension_numbers<[1], [0], [0], [1], [0, 0, 1, 1], [], []>} : vector<16x32xbf16>, vector<32x32xbf16>, vector<16x32xf32> -> vector<16x32xf32>
    %9 = arith.index_cast %arg2 : i32 to index
    %c0_4 = arith.constant 0 : index
    %c0_5 = arith.constant 0 : index
    %10 = vector.load %arg7[%9, %c0_4, %c0_5] : memref<2x1x32xf32, #tpu.memory_space<vmem>>, vector<1x1x32xf32>
    %11 = vector.shape_cast %10 : vector<1x1x32xf32> to vector<1x32xf32>
    %12 = vector.broadcast %11 : vector<1x32xf32> to vector<16x32xf32>
    %13 = arith.addf %8, %12 : vector<16x32xf32>
    %c8_i32 = arith.constant 8 : i32
    %14 = arith.muli %arg2, %c8_i32 : i32
    %15 = vector.extract_strided_slice %13 {offsets = [0, 0], sizes = [16, 8], strides = [1, 1]} : vector<16x32xf32> to vector<16x8xf32>
    %16 = arith.truncf %15 : vector<16x8xf32> to vector<16x8xbf16>
    %c0_i32_6 = arith.constant 0 : i32
    %17 = arith.addi %14, %c0_i32_6 : i32
    %c0_7 = arith.constant 0 : index
    %18 = arith.index_cast %17 : i32 to index
    %c0_8 = arith.constant 0 : index
    %c0_9 = arith.constant 0 : index
    %19 = vector.load %arg5[%c0_7, %18, %c0_8, %c0_9] : memref<1x16x8x8xbf16, #tpu.memory_space<vmem>>, vector<1x1x8x8xbf16>
    %20 = vector.shape_cast %19 : vector<1x1x8x8xbf16> to vector<8x8xbf16>
    %c4_i32 = arith.constant 4 : i32
    %21 = arith.addi %14, %c4_i32 : i32
    %c0_i32_10 = arith.constant 0 : i32
    %22 = arith.addi %21, %c0_i32_10 : i32
    %c0_11 = arith.constant 0 : index
    %23 = arith.index_cast %22 : i32 to index
    %c0_12 = arith.constant 0 : index
    %c0_13 = arith.constant 0 : index
    %24 = vector.load %arg5[%c0_11, %23, %c0_12, %c0_13] : memref<1x16x8x8xbf16, #tpu.memory_space<vmem>>, vector<1x1x8x8xbf16>
    %25 = vector.shape_cast %24 : vector<1x1x8x8xbf16> to vector<8x8xbf16>
    %cst_14 = arith.constant dense<0.000000e+00> : vector<16x8xf32>
    %26 = tpu.matmul %16, %20, %cst_14 {dimension_numbers = #tpu.dot_dimension_numbers<[1], [1], [0], [0], [0, 0, 1, 0], [], []>} : vector<16x8xbf16>, vector<8x8xbf16>, vector<16x8xf32> -> vector<16x8xf32>
    %cst_15 = arith.constant dense<0xFF800000> : vector<16xf32>
    %27 = vector.multi_reduction <maximumf>, %26, %cst_15 [1] : vector<16x8xf32> to vector<16xf32>
    %28 = vector.shape_cast %27 : vector<16xf32> to vector<16x1xf32>
    %29 = vector.broadcast %28 : vector<16x1xf32> to vector<16x8xf32>
    %30 = arith.subf %26, %29 : vector<16x8xf32>
    %31 = math.exp %30 : vector<16x8xf32>
    %cst_16 = arith.constant dense<0.000000e+00> : vector<16xf32>
    %32 = vector.multi_reduction <add>, %31, %cst_16 [1] : vector<16x8xf32> to vector<16xf32>
    %33 = vector.shape_cast %32 : vector<16xf32> to vector<16x1xf32>
    %34 = vector.broadcast %33 : vector<16x1xf32> to vector<16x8xf32>
    %35 = arith.divf %31, %34 : vector<16x8xf32>
    %36 = arith.truncf %35 : vector<16x8xf32> to vector<16x8xbf16>
    %cst_17 = arith.constant dense<0.000000e+00> : vector<16x8xf32>
    %37 = tpu.matmul %36, %25, %cst_17 {dimension_numbers = #tpu.dot_dimension_numbers<[1], [0], [0], [1], [0, 0, 1, 1], [], []>} : vector<16x8xbf16>, vector<8x8xbf16>, vector<16x8xf32> -> vector<16x8xf32>
    %38 = arith.truncf %37 : vector<16x8xf32> to vector<16x8xbf16>
    %c4_i32_18 = arith.constant 4 : i32
    %39 = arith.muli %arg2, %c4_i32_18 : i32
    %c0_i32_19 = arith.constant 0 : i32
    %40 = arith.addi %39, %c0_i32_19 : i32
    %41 = arith.index_cast %40 : i32 to index
    %c0_20 = arith.constant 0 : index
    %c0_21 = arith.constant 0 : index
    %42 = vector.load %arg8[%41, %c0_20, %c0_21] : memref<8x8x32xbf16, #tpu.memory_space<vmem>>, vector<1x8x32xbf16>
    %43 = vector.shape_cast %42 : vector<1x8x32xbf16> to vector<8x32xbf16>
    %cst_22 = arith.constant dense<0.000000e+00> : vector<16x32xf32>
    %44 = tpu.matmul %38, %43, %cst_22 {dimension_numbers = #tpu.dot_dimension_numbers<[1], [0], [0], [1], [0, 0, 1, 1], [], []>} : vector<16x8xbf16>, vector<8x32xbf16>, vector<16x32xf32> -> vector<16x32xf32>
    %45 = vector.extract_strided_slice %13 {offsets = [0, 8], sizes = [16, 8], strides = [1, 1]} : vector<16x32xf32> to vector<16x8xf32>
    %46 = arith.truncf %45 : vector<16x8xf32> to vector<16x8xbf16>
    %c1_i32 = arith.constant 1 : i32
    %47 = arith.addi %14, %c1_i32 : i32
    %c0_23 = arith.constant 0 : index
    %48 = arith.index_cast %47 : i32 to index
    %c0_24 = arith.constant 0 : index
    %c0_25 = arith.constant 0 : index
    %49 = vector.load %arg5[%c0_23, %48, %c0_24, %c0_25] : memref<1x16x8x8xbf16, #tpu.memory_space<vmem>>, vector<1x1x8x8xbf16>
    %50 = vector.shape_cast %49 : vector<1x1x8x8xbf16> to vector<8x8xbf16>
    %c4_i32_26 = arith.constant 4 : i32
    %51 = arith.addi %14, %c4_i32_26 : i32
    %c1_i32_27 = arith.constant 1 : i32
    %52 = arith.addi %51, %c1_i32_27 : i32
    %c0_28 = arith.constant 0 : index
    %53 = arith.index_cast %52 : i32 to index
    %c0_29 = arith.constant 0 : index
    %c0_30 = arith.constant 0 : index
    %54 = vector.load %arg5[%c0_28, %53, %c0_29, %c0_30] : memref<1x16x8x8xbf16, #tpu.memory_space<vmem>>, vector<1x1x8x8xbf16>
    %55 = vector.shape_cast %54 : vector<1x1x8x8xbf16> to vector<8x8xbf16>
    %cst_31 = arith.constant dense<0.000000e+00> : vector<16x8xf32>
    %56 = tpu.matmul %46, %50, %cst_31 {dimension_numbers = #tpu.dot_dimension_numbers<[1], [1], [0], [0], [0, 0, 1, 0], [], []>} : vector<16x8xbf16>, vector<8x8xbf16>, vector<16x8xf32> -> vector<16x8xf32>
    %cst_32 = arith.constant dense<0xFF800000> : vector<16xf32>
    %57 = vector.multi_reduction <maximumf>, %56, %cst_32 [1] : vector<16x8xf32> to vector<16xf32>
    %58 = vector.shape_cast %57 : vector<16xf32> to vector<16x1xf32>
    %59 = vector.broadcast %58 : vector<16x1xf32> to vector<16x8xf32>
    %60 = arith.subf %56, %59 : vector<16x8xf32>
    %61 = math.exp %60 : vector<16x8xf32>
    %cst_33 = arith.constant dense<0.000000e+00> : vector<16xf32>
    %62 = vector.multi_reduction <add>, %61, %cst_33 [1] : vector<16x8xf32> to vector<16xf32>
    %63 = vector.shape_cast %62 : vector<16xf32> to vector<16x1xf32>
    %64 = vector.broadcast %63 : vector<16x1xf32> to vector<16x8xf32>
    %65 = arith.divf %61, %64 : vector<16x8xf32>
    %66 = arith.truncf %65 : vector<16x8xf32> to vector<16x8xbf16>
    %cst_34 = arith.constant dense<0.000000e+00> : vector<16x8xf32>
    %67 = tpu.matmul %66, %55, %cst_34 {dimension_numbers = #tpu.dot_dimension_numbers<[1], [0], [0], [1], [0, 0, 1, 1], [], []>} : vector<16x8xbf16>, vector<8x8xbf16>, vector<16x8xf32> -> vector<16x8xf32>
    %68 = arith.truncf %67 : vector<16x8xf32> to vector<16x8xbf16>
    %c4_i32_35 = arith.constant 4 : i32
    %69 = arith.muli %arg2, %c4_i32_35 : i32
    %c1_i32_36 = arith.constant 1 : i32
    %70 = arith.addi %69, %c1_i32_36 : i32
    %71 = arith.index_cast %70 : i32 to index
    %c0_37 = arith.constant 0 : index
    %c0_38 = arith.constant 0 : index
    %72 = vector.load %arg8[%71, %c0_37, %c0_38] : memref<8x8x32xbf16, #tpu.memory_space<vmem>>, vector<1x8x32xbf16>
    %73 = vector.shape_cast %72 : vector<1x8x32xbf16> to vector<8x32xbf16>
    %cst_39 = arith.constant dense<0.000000e+00> : vector<16x32xf32>
    %74 = tpu.matmul %68, %73, %cst_39 {dimension_numbers = #tpu.dot_dimension_numbers<[1], [0], [0], [1], [0, 0, 1, 1], [], []>} : vector<16x8xbf16>, vector<8x32xbf16>, vector<16x32xf32> -> vector<16x32xf32>
    %75 = arith.addf %44, %74 : vector<16x32xf32>
    %76 = vector.extract_strided_slice %13 {offsets = [0, 16], sizes = [16, 8], strides = [1, 1]} : vector<16x32xf32> to vector<16x8xf32>
    %77 = arith.truncf %76 : vector<16x8xf32> to vector<16x8xbf16>
    %c2_i32 = arith.constant 2 : i32
    %78 = arith.addi %14, %c2_i32 : i32
    %c0_40 = arith.constant 0 : index
    %79 = arith.index_cast %78 : i32 to index
    %c0_41 = arith.constant 0 : index
    %c0_42 = arith.constant 0 : index
    %80 = vector.load %arg5[%c0_40, %79, %c0_41, %c0_42] : memref<1x16x8x8xbf16, #tpu.memory_space<vmem>>, vector<1x1x8x8xbf16>
    %81 = vector.shape_cast %80 : vector<1x1x8x8xbf16> to vector<8x8xbf16>
    %c4_i32_43 = arith.constant 4 : i32
    %82 = arith.addi %14, %c4_i32_43 : i32
    %c2_i32_44 = arith.constant 2 : i32
    %83 = arith.addi %82, %c2_i32_44 : i32
    %c0_45 = arith.constant 0 : index
    %84 = arith.index_cast %83 : i32 to index
    %c0_46 = arith.constant 0 : index
    %c0_47 = arith.constant 0 : index
    %85 = vector.load %arg5[%c0_45, %84, %c0_46, %c0_47] : memref<1x16x8x8xbf16, #tpu.memory_space<vmem>>, vector<1x1x8x8xbf16>
    %86 = vector.shape_cast %85 : vector<1x1x8x8xbf16> to vector<8x8xbf16>
    %cst_48 = arith.constant dense<0.000000e+00> : vector<16x8xf32>
    %87 = tpu.matmul %77, %81, %cst_48 {dimension_numbers = #tpu.dot_dimension_numbers<[1], [1], [0], [0], [0, 0, 1, 0], [], []>} : vector<16x8xbf16>, vector<8x8xbf16>, vector<16x8xf32> -> vector<16x8xf32>
    %cst_49 = arith.constant dense<0xFF800000> : vector<16xf32>
    %88 = vector.multi_reduction <maximumf>, %87, %cst_49 [1] : vector<16x8xf32> to vector<16xf32>
    %89 = vector.shape_cast %88 : vector<16xf32> to vector<16x1xf32>
    %90 = vector.broadcast %89 : vector<16x1xf32> to vector<16x8xf32>
    %91 = arith.subf %87, %90 : vector<16x8xf32>
    %92 = math.exp %91 : vector<16x8xf32>
    %cst_50 = arith.constant dense<0.000000e+00> : vector<16xf32>
    %93 = vector.multi_reduction <add>, %92, %cst_50 [1] : vector<16x8xf32> to vector<16xf32>
    %94 = vector.shape_cast %93 : vector<16xf32> to vector<16x1xf32>
    %95 = vector.broadcast %94 : vector<16x1xf32> to vector<16x8xf32>
    %96 = arith.divf %92, %95 : vector<16x8xf32>
    %97 = arith.truncf %96 : vector<16x8xf32> to vector<16x8xbf16>
    %cst_51 = arith.constant dense<0.000000e+00> : vector<16x8xf32>
    %98 = tpu.matmul %97, %86, %cst_51 {dimension_numbers = #tpu.dot_dimension_numbers<[1], [0], [0], [1], [0, 0, 1, 1], [], []>} : vector<16x8xbf16>, vector<8x8xbf16>, vector<16x8xf32> -> vector<16x8xf32>
    %99 = arith.truncf %98 : vector<16x8xf32> to vector<16x8xbf16>
    %c4_i32_52 = arith.constant 4 : i32
    %100 = arith.muli %arg2, %c4_i32_52 : i32
    %c2_i32_53 = arith.constant 2 : i32
    %101 = arith.addi %100, %c2_i32_53 : i32
    %102 = arith.index_cast %101 : i32 to index
    %c0_54 = arith.constant 0 : index
    %c0_55 = arith.constant 0 : index
    %103 = vector.load %arg8[%102, %c0_54, %c0_55] : memref<8x8x32xbf16, #tpu.memory_space<vmem>>, vector<1x8x32xbf16>
    %104 = vector.shape_cast %103 : vector<1x8x32xbf16> to vector<8x32xbf16>
    %cst_56 = arith.constant dense<0.000000e+00> : vector<16x32xf32>
    %105 = tpu.matmul %99, %104, %cst_56 {dimension_numbers = #tpu.dot_dimension_numbers<[1], [0], [0], [1], [0, 0, 1, 1], [], []>} : vector<16x8xbf16>, vector<8x32xbf16>, vector<16x32xf32> -> vector<16x32xf32>
    %106 = arith.addf %75, %105 : vector<16x32xf32>
    %107 = vector.extract_strided_slice %13 {offsets = [0, 24], sizes = [16, 8], strides = [1, 1]} : vector<16x32xf32> to vector<16x8xf32>
    %108 = arith.truncf %107 : vector<16x8xf32> to vector<16x8xbf16>
    %c3_i32 = arith.constant 3 : i32
    %109 = arith.addi %14, %c3_i32 : i32
    %c0_57 = arith.constant 0 : index
    %110 = arith.index_cast %109 : i32 to index
    %c0_58 = arith.constant 0 : index
    %c0_59 = arith.constant 0 : index
    %111 = vector.load %arg5[%c0_57, %110, %c0_58, %c0_59] : memref<1x16x8x8xbf16, #tpu.memory_space<vmem>>, vector<1x1x8x8xbf16>
    %112 = vector.shape_cast %111 : vector<1x1x8x8xbf16> to vector<8x8xbf16>
    %c4_i32_60 = arith.constant 4 : i32
    %113 = arith.addi %14, %c4_i32_60 : i32
    %c3_i32_61 = arith.constant 3 : i32
    %114 = arith.addi %113, %c3_i32_61 : i32
    %c0_62 = arith.constant 0 : index
    %115 = arith.index_cast %114 : i32 to index
    %c0_63 = arith.constant 0 : index
    %c0_64 = arith.constant 0 : index
    %116 = vector.load %arg5[%c0_62, %115, %c0_63, %c0_64] : memref<1x16x8x8xbf16, #tpu.memory_space<vmem>>, vector<1x1x8x8xbf16>
    %117 = vector.shape_cast %116 : vector<1x1x8x8xbf16> to vector<8x8xbf16>
    %cst_65 = arith.constant dense<0.000000e+00> : vector<16x8xf32>
    %118 = tpu.matmul %108, %112, %cst_65 {dimension_numbers = #tpu.dot_dimension_numbers<[1], [1], [0], [0], [0, 0, 1, 0], [], []>} : vector<16x8xbf16>, vector<8x8xbf16>, vector<16x8xf32> -> vector<16x8xf32>
    %cst_66 = arith.constant dense<0xFF800000> : vector<16xf32>
    %119 = vector.multi_reduction <maximumf>, %118, %cst_66 [1] : vector<16x8xf32> to vector<16xf32>
    %120 = vector.shape_cast %119 : vector<16xf32> to vector<16x1xf32>
    %121 = vector.broadcast %120 : vector<16x1xf32> to vector<16x8xf32>
    %122 = arith.subf %118, %121 : vector<16x8xf32>
    %123 = math.exp %122 : vector<16x8xf32>
    %cst_67 = arith.constant dense<0.000000e+00> : vector<16xf32>
    %124 = vector.multi_reduction <add>, %123, %cst_67 [1] : vector<16x8xf32> to vector<16xf32>
    %125 = vector.shape_cast %124 : vector<16xf32> to vector<16x1xf32>
    %126 = vector.broadcast %125 : vector<16x1xf32> to vector<16x8xf32>
    %127 = arith.divf %123, %126 : vector<16x8xf32>
    %128 = arith.truncf %127 : vector<16x8xf32> to vector<16x8xbf16>
    %cst_68 = arith.constant dense<0.000000e+00> : vector<16x8xf32>
    %129 = tpu.matmul %128, %117, %cst_68 {dimension_numbers = #tpu.dot_dimension_numbers<[1], [0], [0], [1], [0, 0, 1, 1], [], []>} : vector<16x8xbf16>, vector<8x8xbf16>, vector<16x8xf32> -> vector<16x8xf32>
    %130 = arith.truncf %129 : vector<16x8xf32> to vector<16x8xbf16>
    %c4_i32_69 = arith.constant 4 : i32
    %131 = arith.muli %arg2, %c4_i32_69 : i32
    %c3_i32_70 = arith.constant 3 : i32
    %132 = arith.addi %131, %c3_i32_70 : i32
    %133 = arith.index_cast %132 : i32 to index
    %c0_71 = arith.constant 0 : index
    %c0_72 = arith.constant 0 : index
    %134 = vector.load %arg8[%133, %c0_71, %c0_72] : memref<8x8x32xbf16, #tpu.memory_space<vmem>>, vector<1x8x32xbf16>
    %135 = vector.shape_cast %134 : vector<1x8x32xbf16> to vector<8x32xbf16>
    %cst_73 = arith.constant dense<0.000000e+00> : vector<16x32xf32>
    %136 = tpu.matmul %130, %135, %cst_73 {dimension_numbers = #tpu.dot_dimension_numbers<[1], [0], [0], [1], [0, 0, 1, 1], [], []>} : vector<16x8xbf16>, vector<8x32xbf16>, vector<16x32xf32> -> vector<16x32xf32>
    %137 = arith.addf %106, %136 : vector<16x32xf32>
    %138 = arith.index_cast %arg2 : i32 to index
    %c0_74 = arith.constant 0 : index
    %c0_75 = arith.constant 0 : index
    %139 = vector.load %arg9[%138, %c0_74, %c0_75] : memref<2x1x32xf32, #tpu.memory_space<vmem>>, vector<1x1x32xf32>
    %140 = vector.shape_cast %139 : vector<1x1x32xf32> to vector<1x32xf32>
    %141 = vector.broadcast %140 : vector<1x32xf32> to vector<16x32xf32>
    %142 = arith.addf %137, %141 : vector<16x32xf32>
    %c0_76 = arith.constant 0 : index
    %c0_77 = arith.constant 0 : index
    %143 = vector.load %arg11[%c0_76, %c0_77] : memref<16x32xf32, #tpu.memory_space<vmem>>, vector<16x32xf32>
    tpu.vector_store %arg11[%c0_76, %c0_77], %142 {strides = array<i32>} : memref<16x32xf32, #tpu.memory_space<vmem>>, vector<16x32xf32>,
    %c1_i32_78 = arith.constant 1 : i32
    %144 = arith.cmpi eq, %arg2, %c1_i32_78 : i32
    %145 = arith.extui %144 : i1 to i32
    %c0_i32_79 = arith.constant 0 : i32
    %146 = arith.cmpi ne, %145, %c0_i32_79 : i32
    scf.if %146 {
      %c0_80 = arith.constant 0 : index
      %c0_81 = arith.constant 0 : index
      %c0_82 = arith.constant 0 : index
      %147 = vector.load %arg10[%c0_80, %c0_81, %c0_82] : memref<1x16x32xf32, #tpu.memory_space<vmem>>, vector<1x16x32xf32>
      %148 = vector.shape_cast %147 : vector<1x16x32xf32> to vector<16x32xf32>
      %149 = vector.shape_cast %142 : vector<16x32xf32> to vector<1x16x32xf32>
      tpu.vector_store %arg10[%c0_80, %c0_81, %c0_82], %149 {strides = array<i32>} : memref<1x16x32xf32, #tpu.memory_space<vmem>>, vector<1x16x32xf32>,
    } else {
    }
    return
  }
  func.func @transform_0(%arg0: i32, %arg1: i32, %arg2: i32, %arg3: memref<2xi32, #tpu.memory_space<smem>>) -> (i32, i32, i32) {
    %c0_i32 = arith.constant 0 : i32
    %c0_i32_0 = arith.constant 0 : i32
    return %arg0, %arg1, %c0_i32 : i32, i32, i32
  }
  func.func @transform_1(%arg0: i32, %arg1: i32, %arg2: i32, %arg3: memref<2xi32, #tpu.memory_space<smem>>) -> (i32, i32, i32, i32) {
    %c0_i32 = arith.constant 0 : i32
    %c0_i32_0 = arith.constant 0 : i32
    %c0_i32_1 = arith.constant 0 : i32
    %c0_i32_2 = arith.constant 0 : i32
    return %arg0, %c0_i32, %c0_i32_0, %c0_i32_1 : i32, i32, i32, i32
  }
  func.func @transform_2(%arg0: i32, %arg1: i32, %arg2: i32, %arg3: memref<2xi32, #tpu.memory_space<smem>>) -> (i32, i32, i32) {
    %c0_i32 = arith.constant 0 : i32
    %c0_i32_0 = arith.constant 0 : i32
    %c0_i32_1 = arith.constant 0 : i32
    %c0_i32_2 = arith.constant 0 : i32
    return %c0_i32, %c0_i32_0, %c0_i32_1 : i32, i32, i32
  }
  func.func @transform_3(%arg0: i32, %arg1: i32, %arg2: i32, %arg3: memref<2xi32, #tpu.memory_space<smem>>) -> (i32, i32, i32) {
    %c0_i32 = arith.constant 0 : i32
    %c0_i32_0 = arith.constant 0 : i32
    %c0_i32_1 = arith.constant 0 : i32
    %c0_i32_2 = arith.constant 0 : i32
    return %c0_i32, %c0_i32_0, %c0_i32_1 : i32, i32, i32
  }
  func.func @transform_4(%arg0: i32, %arg1: i32, %arg2: i32, %arg3: memref<2xi32, #tpu.memory_space<smem>>) -> (i32, i32, i32) {
    %c0_i32 = arith.constant 0 : i32
    %c0_i32_0 = arith.constant 0 : i32
    %c0_i32_1 = arith.constant 0 : i32
    %c0_i32_2 = arith.constant 0 : i32
    return %c0_i32, %c0_i32_0, %c0_i32_1 : i32, i32, i32
  }
  func.func @transform_5(%arg0: i32, %arg1: i32, %arg2: i32, %arg3: memref<2xi32, #tpu.memory_space<smem>>) -> (i32, i32, i32) {
    %c0_i32 = arith.constant 0 : i32
    %c0_i32_0 = arith.constant 0 : i32
    %c0_i32_1 = arith.constant 0 : i32
    %c0_i32_2 = arith.constant 0 : i32
    return %c0_i32, %c0_i32_0, %c0_i32_1 : i32, i32, i32
  }
  func.func @transform_6(%arg0: i32, %arg1: i32, %arg2: i32, %arg3: memref<2xi32, #tpu.memory_space<smem>>) -> (i32, i32, i32) {
    %c0_i32 = arith.constant 0 : i32
    %c0_i32_0 = arith.constant 0 : i32
    return %arg0, %arg1, %c0_i32 : i32, i32, i32
  }
}

</mosaic_0001>

<bundles_post_ra>
// kernel: tpu_custom_call.1
= control target key start
LH: loop header
LB: loop body
LE: loop exit
PB: predicated region body
PF: predicated region fallthrough
CT: control target
= control target key end

     0   :  { %s2052_s0 = inlined_call_operand.vmem [shape: s32[2], index: 0, kind: input, shape index: {}]   ;;  %s2053_s1 = inlined_call_operand.vmem [shape: f32[2,16,32], index: 1, kind: input, shape index: {}]   ;;  %s2054_s2 = inlined_call_operand.vmem [shape: bf16[2,16,8,8], index: 2, kind: input, shape index: {}]   ;;  %s2055_s3 = inlined_call_operand.vmem [shape: bf16[2,32,32], index: 3, kind: input, shape index: {}]   ;;  %s2056_s4 = inlined_call_operand.vmem [shape: f32[2,1,32], index: 4, kind: input, shape index: {}]   ;;  %s2057_s5 = inlined_call_operand.vmem [shape: bf16[8,8,32], index: 5, kind: input, shape index: {}]   ;;  %s2058_s6 = inlined_call_operand.vmem [shape: f32[2,1,32], index: 6, kind: input, shape index: {}]   ;;  %s2059_s7 = inlined_call_operand.hbm [shape: f32[2,16,32], index: 7, kind: output, shape index: {}]  }
   0x1   :  { %s12_s26 = sshll.u32 %s2052_s0, 4  ;;  %s13_s26 = int_to_ptr.vmem [resolvable:$true] %s12_s26 }
   0x2   :  { %s1605_s27 = scalar_lea.vmem %s13_s26, 16  ;;  %p1610_p1 = scmp.lt.s32.totalorder %s13_s26, %s13_s26 }
   0x3   :  { %p1606_p0 = scmp.ne.s32.totalorder %s13_s26, %s1605_s27  ;;  %p1611_p2 = scmp.lt.s32.totalorder %s1605_s27, %s1605_s27 }
   0x5   :  { %p1612_p3 = por %p1611_p2, %p1610_p1 }
   0x7   :  { %p1613_p4 = pnand %p1612_p3, %p1606_p0 }
   0x9   :  { %1616 = shalt.err (!%p1613_p4)  }
   0xa   :  { %s1715_s28 = smov [#allocation4]  }
   0xb   :  { %15 = dma.vmem_to_smem %s13_s26, 16, %s1715_s28, [#allocation3] }
   0xc   :  { %1677 = dma.done.wait [#allocation3], 16 }
   0xd   :  { %1678 = vsyncadd [#allocation3], 4294967280 }
   0xe   :  { %17 = sfence }
   0xf   :  { %18 = vsyncpa [#allocation6], 0 }
  0x10   :  { %20 = vsyncpa [#allocation6 + $0x1], 0  ;;  %s1767_s29 = smov 0   ;;  %s1769_s30 = smov 0  }
  0x11   :  { %s1771_s0 = smov 0   ;;  %s1773_s8 = smov 0  }
  0x12   :  { %s1775_s9 = smov 0   ;;  %s1777_s10 = smov 0  }
  0x13   :  { %s1779_s11 = smov 0   ;;  %s1781_s12 = smov 0  }
  0x14 LB: > { %s1300_s13 = sadd.s32 4294967295, %s1713_s12   ;;  %s1301_s14 = sadd.s32 4294967294, %s1713_s12   ;;  %s1713_s12 = sphi %s1781_s12, %s26_s12   ;;  %s1709_s11 = sphi %s1779_s11, %s2071_s11   ;;  %s1705_s10 = sphi %s1777_s10, %s2070_s10   ;;  %s1701_s9 = sphi %s1775_s9, %s2069_s9   ;;  %s1697_s8 = sphi %s1773_s8, %s2068_s8   ;;  %s1693_s0 = sphi %s1771_s0, %s2067_s0   ;;  %s1689_s30 = sphi %s1769_s30, %s2066_s30   ;;  %s1685_s29 = sphi %s1767_s29, %s2065_s29  }
  0x15   : > { %s38_s15 = sadd.s32 1, %s1705_s10  ;;  %s45_s16 = sadd.s32 1, %s1709_s11 }
  0x16   : > { %p39_p5 = scmp.ge.s32.totalorder %s38_s15, 2  ;;  %p202_p6 = scmp.ne.s32.totalorder %s1693_s0, %s1689_s30 }
  0x17   : > { %p203_p7 = scmp.eq.s32.totalorder %s1300_s13, 3  ;;  %p208_p9 = scmp.ne.s32.totalorder %s1689_s30, %s1685_s29 }
  0x18   : > { %s2073_s15 = smov (%p39_p5, %s38_s15), 0  ;;  %s2075_s16 = smov (!%p39_p5, %s45_s16), %s1709_s11 }
  0x19   : > { %p1816_p8 = por %p203_p7, %p202_p6  ;;  %p47_p10 = scmp.ge.s32.totalorder %s2075_s16, 2 }
  0x1a   : > { %p209_p11 = scmp.eq.s32.totalorder %s1301_s14, 3  ;;  %p1304_p12 = scmp.ge.s32.totalorder %s1713_s12, 1 }
  0x1b   : > { %p260_p13 = scmp.lt.s32.totalorder %s1713_s12, 5  ;;  %s2077_s16 = smov (%p47_p10, %s2075_s16), 0 }
  0x1c   : > { %2062 = sst [smem:[#allocation9_spill]] %s2077_s16  ;;  %p1826_p0 = por %p209_p11, %p208_p9 }
  0x1d   : > { %p261_p1 = pnand %p1304_p12, %p260_p13  ;;  %s187_s19 = ssub.s32 %s1709_s11, %s2077_s16 }
  0x1e   : > { %s192_s20 = sadd.s32 1, %s1693_s0  ;;  %p190_p2 = scmp.eq.s32.totalorder %s187_s19, 0 }
  0x1f   : > { %264 = sbr.rel (%p261_p1) target bundleno = 2677 (0xa75), region = 44  ;;  %s296_s22 = sand.u32 (!%p261_p1), 1, %s1689_s30  }
  0x20   : > { %s1834_s21 = scalar_select %p190_p2, %s1693_s0, %s192_s20  }
  0x21   : > { %p300_p3 = scmp.lt.s32.totalorder (!%p261_p1), %s1701_s9, 1  ;;  %s1305_s23 = sshll.u32 (!%p261_p1), %s296_s22, 4 }
  0x22   : > { %s1849_s16 = scalar_lea.vmem (!%p261_p1), [#allocation5], %s1305_s23  ;;  %p1310_p4 = scmp.ne.s32.totalorder (!%p261_p1), %s1697_s8, 0 }
  0x26   : > { %s301_s24 = scalar_select %p300_p3, %s1701_s9, 1 }
  0x27   : > { %319 = sbr.rel (%p1310_p4) target bundleno = 46 (0x2e), region = 48  ;;  %vm322_vm0 = vcmask (!%p1310_p4), 261120  }
  0x28   : > { %s1369_s25 = sshll.u32 %s301_s24, 4  ;;  %s1370_s26 = sshll.u32 %s301_s24, 6 }
  0x29   : > { %s307_s13 = scalar_lea.vmem %s2053_s1, %s1369_s25  ;;  %s1847_s20 = scalar_lea.vmem %s2054_s2, %s1370_s26 }
  0x2a   : > { %v320_v0 = vld [vmem:[%s307_s13] sm:$0xff] (!%p1310_p4)  ;;  %v321_v1 = vld [vmem:[%s307_s13 + $0x8] sm:$0xff] (!%p1310_p4) }
  0x2b   : > { %323 = vst.msk [vmem:[#allocation2] sm:$0xff] (!%p1310_p4), %vm322_vm0, %v320_v0  ;;  %324 = vst.msk [vmem:[#allocation2 + $0x8] sm:$0xff] (!%p1310_p4), %vm322_vm0, %v321_v1 }
  0x2e PF: > { %s1371_s24 = sshll.u32 %s1697_s8, 4  ;;  %v1716_v2 = vmov 0.0   ;;  %vm1717_vm1 = vmmov 0   ;;  %vm355_vm2 = vcmask 261120   ;;  %s1372_s27 = sshll.u32 %s1697_s8, 5  ;;  %vm409_vm3 = vcmask 64512  }
  0x2f   : > { %1412 = vmatprep.subr.bf16.mxu0 %v1716_v2  ;;  %s330_s23 = scalar_lea.vmem %s2055_s3, %s1371_s24  ;;  %1416 = vmatprep.mubr.msk.bf16.mxu0 %vm1717_vm1, %v1716_v2  ;;  %s1871_s28 = scalar_lea.vmem %s1847_s20, %s1372_s27  ;;  %vm483_vm4 = vcmask 1043456  }
  0x30   : > { %v1571_v3 = vld [vmem:[%s330_s23] sm:$0xff]   ;;  %1420 = vmatprep.subr.bf16.mxu1 %v1716_v2  ;;  %1422 = vmatprep.mubr.msk.bf16.mxu1 %vm1717_vm1, %v1716_v2  ;;  %v1572_v4 = vld [vmem:[%s330_s23 + $0x8] sm:$0xff]   ;;  %s335_s19 = scalar_lea.vmem %s2056_s4, %s1697_s8  ;;  %s1718_s20 = smov 120   ;;  %v1321_v43 = vld [vmem:[%s1871_s28 + $0x10] sm:$0xf] }
  0x31   : > { %1413 = vmatpush3.bf16.msra.mxu0 %v1571_v3  ;;  %v404_v8 = vld [vmem:[%s1871_s28] sm:$0xf]  ;;  %v1327_v14 = vld [vmem:[%s1871_s28 + $0x4] sm:$0xf]  ;;  %v485_v44 = vsel %vm483_vm4, %v1321_v43, 0  ;;  %s1719_s25 = smov 112   ;;  %s1916_s27 = scalar_lea.vmem %s2057_s5, %s1371_s24 }
  0x32   : > { %v325_v5 = vld [vmem:[#allocation2] sm:$0xff]  ;;  %v326_v6 = vld [vmem:[#allocation2 + $0x8] sm:$0xff]  ;;  %1414 = vmatprep.subr.bf16.mxu0 %v1716_v2  ;;  %v414_v9 = vsel %vm409_vm3, %v404_v8, 0  ;;  %v547_v19 = vsel %vm409_vm3, %v1327_v14, 0  ;;  %v1330_v59 = vld [vmem:[%s1871_s28 + $0x14] sm:$0xf]  ;;  %s1121_s14 = scalar_lea.vmem %s2058_s6, %s1697_s8 }
  0x33   : > { %v327_v7 = vpack.c.bf16 %v326_v6, %v325_v5  ;;  %1421 = vmatpush3.bf16.xpose.msra.mxu1 %v414_v9  ;;  %v1313_v10 = vld [vmem:[%s335_s19] ss:$0 sm:$0xff]  ;;  %v617_v63 = vsel %vm483_vm4, %v1330_v59, 0  ;;  %v1335_v0 = vld [vmem:[%s1916_s27 + $0x4] sm:$0xf]  ;;  %s1720_s24 = smov 104  }
  0x34   : > { %1432 = vmatprep.subr.bf16.mxu1 %v1716_v2  ;;  %v669_v1 = vsel %vm483_vm4, %v1335_v0, 0  ;;  %p1363_p5 = scmp.ne.s32.totalorder %s1697_s8, 1 }
  0x35   : > { %1415 = vmatpush3.bf16.msra.mxu0 %v1572_v4 }
  0x36   : > { %1426 = vmatprep.subr.bf16.mxu0 %v1716_v2 }
  0x38   : > { %1417 = vmatmul.mubr.msk.bf16.vlgmr.msra.gmra.mrb[0].mxu0 %vm355_vm2, %v327_v7  ;;  %v531_v7 = vld [vmem:[%s1916_s27] sm:$0xf] }
  0x39   : > { %1428 = vmatprep.mubr.msk.bf16.mxu0 %vm1717_vm1, %v1716_v2  ;;  %1427 = vmatpush3.bf16.msra.mxu0 %v485_v44 }
  0x3a   : > { %1438 = vmatprep.subr.bf16.mxu0 %v1716_v2 }
 0x10b   : > { %v393_v11 = vpop.f32.mrb[0].mxu0 }
 0x10c   : > { %v1418_v12 = vpop.f32.mrb[1].mxu0  ;;  %v394_v15 = vadd.f32 %v1313_v10, %v393_v11  ;;  %v716_v11 = vsel %vm483_vm4, %v531_v7, 0 }
 0x10d   : > { %v396_v13 = vpop.f32.mrb[2].mxu0 }
 0x10e   : > { %v397_v16 = vadd.f32 %v1313_v10, %v396_v13  ;;  %v1419_v17 = vpop.f32.mrb[3].mxu0 }
 0x110   : > { %v1881_v18 = vpack.c.bf16 %v397_v16, %v394_v15 }
 0x112   : > { %541 = vrot.lane.b32.xlu0 %v1881_v18, %s1718_s20  ;;  %1423 = vmatmul.mubr.msk.bf16.vlgmr.msra.gmra.mrb[0].mxu1 %vm409_vm3, %v1881_v18 }
 0x113   : > { %1433 = vmatpush3.bf16.xpose.msra.mxu1 %v547_v19  ;;  %1434 = vmatprep.mubr.msk.bf16.mxu1 %vm1717_vm1, %v1716_v2  ;;  %v1340_v19 = vld [vmem:[%s1871_s28 + $0x8] sm:$0xf] }
 0x114   : > { %1444 = vmatprep.subr.bf16.mxu1 %v1716_v2 }
 0x184   : > { %v542_v20 = vpop.permute.xlu0 %541 }
 0x185   : > { %1435 = vmatmul.mubr.msk.bf16.vlgmr.msra.gmra.mrb[4].mxu1 %vm409_vm3, %v542_v20 }
 0x186   : > { %1446 = vmatprep.mubr.msk.bf16.mxu1 %vm1717_vm1, %v1716_v2  ;;  %1445 = vmatpush3.bf16.msra.mxu1 %v669_v1 }
 0x187   : > { %1456 = vmatprep.subr.bf16.mxu1 %v1716_v2 }
 0x1e5   : > { %v450_v21 = vpop.f32.mrb[0].mxu1 }
 0x1e6   : > { %v1424_v22 = vpop.f32.mrb[1].mxu1  ;;  %v457_v23 = vsel %vm409_vm3, %v450_v21, -inf }
 0x1e7   : > { %458 = vmax.xlane.f32.xlu0 %v457_v23  ;;  %v453_v24 = vpop.f32.mrb[2].mxu1 }
 0x1e8   : > { %v1425_v25 = vpop.f32.mrb[3].mxu1  ;;  %v460_v26 = vsel %vm409_vm3, %v453_v24, -inf }
 0x1e9   : > { %461 = vmax.xlane.f32.xlu1 %v460_v26 }
 0x258   : > { %v583_v27 = vpop.f32.mrb[4].mxu1 }
 0x259   : > { %v1436_v28 = vpop.f32.mrb[5].mxu1  ;;  %v590_v29 = vsel %vm409_vm3, %v583_v27, -inf }
 0x25a   : > { %591 = vmax.xlane.f32.xlu1 %v590_v29  ;;  %v586_v30 = vpop.f32.mrb[6].mxu1 }
 0x25b   : > { %v1437_v31 = vpop.f32.mrb[7].mxu1  ;;  %v593_v32 = vsel %vm409_vm3, %v586_v30, -inf }
 0x25e   : > { %594 = vmax.xlane.f32.xlu1 %v593_v32 }
 0x274   : > { %v459_v33 = vpop.xlane.xlu0 %458 }
 0x275   : > { %v463_v34 = vsub.f32 %v450_v21, %v459_v33 }
 0x276   : > { %v462_v35 = vpop.xlane.xlu1 %461 }
 0x277   : > { %v465_v36 = vmul.f32 1.442695, %v463_v34  ;;  %v464_v37 = vsub.f32 %v453_v24, %v462_v35  ;;  %v773_v24 = vsel %vm409_vm3, %v1340_v19, 0 }
 0x279   : > { %1573 = vpow2.f32 %v465_v36  ;;  %v467_v38 = vmul.f32 1.442695, %v464_v37 }
 0x27b   : > { %1575 = vpow2.f32 %v467_v38 }
 0x283   : > { %v1574_v39 = vpop.eup %1573 }
 0x284   : > { %v469_v40 = vsel %vm409_vm3, %v1574_v39, 0.0 }
 0x285   : > { %v1576_v41 = vpop.eup %1575  ;;  %470 = vadd.xlane.f32.xlu1 %v469_v40 }
 0x286   : > { %v472_v42 = vsel %vm409_vm3, %v1576_v41, 0.0 }
 0x289   : > { %473 = vadd.xlane.f32.xlu1 %v472_v42 }
 0x2e7   : > { %v592_v45 = vpop.xlane.xlu1 %591 }
 0x2e8   : > { %v596_v46 = vsub.f32 %v583_v27, %v592_v45 }
 0x2ea   : > { %v598_v47 = vmul.f32 1.442695, %v596_v46 }
 0x2eb   : > { %v595_v48 = vpop.xlane.xlu1 %594 }
 0x2ec   : > { %1577 = vpow2.f32 %v598_v47  ;;  %v597_v49 = vsub.f32 %v586_v30, %v595_v48 }
 0x2ee   : > { %v600_v50 = vmul.f32 1.442695, %v597_v49 }
 0x2f0   : > { %1579 = vpow2.f32 %v600_v50 }
 0x2f6   : > { %v1578_v51 = vpop.eup %1577 }
 0x2f7   : > { %v602_v52 = vsel %vm409_vm3, %v1578_v51, 0.0 }
 0x2f8   : > { %603 = vadd.xlane.f32.xlu1 %v602_v52  ;;  %v1343_v52 = vld [vmem:[%s1871_s28 + $0x18] sm:$0xf] }
 0x2fa   : > { %v1580_v53 = vpop.eup %1579 }
 0x2fb   : > { %v605_v54 = vsel %vm409_vm3, %v1580_v53, 0.0 }
 0x2fc   : > { %606 = vadd.xlane.f32.xlu1 %v605_v54 }
 0x30d   : > { %767 = vrot.lane.b32.xlu1 %v1881_v18, %s1719_s25 }
 0x312   : > { %v471_v55 = vpop.xlane.xlu1 %470 }
 0x313   : > { %1581 = vrcp.f32 %v471_v55 }
 0x316   : > { %v474_v56 = vpop.xlane.xlu1 %473 }
 0x317   : > { %1583 = vrcp.f32 %v474_v56 }
 0x31d   : > { %v1582_v57 = vpop.eup %1581 }
 0x31e   : > { %v476_v60 = vmul.f32 %v1582_v57, %v1574_v39 }
 0x321   : > { %v1584_v58 = vpop.eup %1583 }
 0x322   : > { %v478_v61 = vmul.f32 %v1584_v58, %v1576_v41  ;;  %v1352_v58 = vld [vmem:[%s1871_s28 + $0xc] sm:$0xf] }
 0x324   : > { %v479_v62 = vpack.c.bf16 %v478_v61, %v476_v60 }
 0x326   : > { %1429 = vmatmul.mubr.msk.bf16.vlgmr.msra.gmra.mrb[4].mxu0 %vm409_vm3, %v479_v62  ;;  %v954_v62 = vsel %vm409_vm3, %v1352_v58, 0 }
 0x327   : > { %1439 = vmatpush3.bf16.msra.mxu0 %v617_v63  ;;  %1440 = vmatprep.mubr.msk.bf16.mxu0 %vm1717_vm1, %v1716_v2  ;;  %v1348_v63 = vld [vmem:[%s1916_s27 + $0x8] sm:$0xf] }
 0x328   : > { %1450 = vmatprep.subr.bf16.mxu0 %v1716_v2  ;;  %v895_v0 = vsel %vm483_vm4, %v1348_v63, 0 }
 0x385   : > { %v604_v3 = vpop.xlane.xlu1 %603 }
 0x386   : > { %1585 = vrcp.f32 %v604_v3 }
 0x389   : > { %v607_v4 = vpop.xlane.xlu1 %606 }
 0x38a   : > { %1587 = vrcp.f32 %v607_v4 }
 0x38d   : > { %v768_v25 = vpop.permute.xlu1 %767 }
 0x390   : > { %v1586_v5 = vpop.eup %1585 }
 0x391   : > { %v609_v8 = vmul.f32 %v1586_v5, %v1578_v51 }
 0x394   : > { %v1588_v6 = vpop.eup %1587 }
 0x395   : > { %v611_v9 = vmul.f32 %v1588_v6, %v1580_v53  ;;  %v843_v53 = vsel %vm483_vm4, %v1343_v52, 0 }
 0x397   : > { %v612_v10 = vpack.c.bf16 %v611_v9, %v609_v8 }
 0x399   : > { %1441 = vmatmul.mubr.msk.bf16.vlgmr.msra.gmra.mrb[8].mxu0 %vm409_vm3, %v612_v10 }
 0x39a   : > { %1451 = vmatpush3.bf16.msra.mxu0 %v716_v11  ;;  %1452 = vmatprep.mubr.msk.bf16.mxu0 %vm1717_vm1, %v1716_v2 }
 0x39b   : > { %1462 = vmatprep.subr.bf16.mxu0 %v1716_v2 }
 0x3f9   : > { %v521_v12 = vpop.f32.mrb[4].mxu0 }
 0x3fa   : > { %v1430_v13 = vpop.f32.mrb[5].mxu0 }
 0x3fb   : > { %v524_v14 = vpop.f32.mrb[6].mxu0 }
 0x3fc   : > { %v528_v15 = vpack.c.bf16 %v524_v14, %v521_v12  ;;  %v1431_v16 = vpop.f32.mrb[7].mxu0 }
 0x3fe   : > { %1453 = vmatmul.mubr.msk.bf16.vlgmr.msra.gmra.mrb[12].mxu0 %vm409_vm3, %v528_v15 }
 0x3ff   : > { %1464 = vmatprep.mubr.msk.bf16.mxu0 %vm1717_vm1, %v1716_v2  ;;  %1463 = vmatpush3.bf16.msra.mxu0 %v843_v53 }
 0x400   : > { %1474 = vmatprep.subr.bf16.mxu0 %v1716_v2 }
 0x46c   : > { %v653_v17 = vpop.f32.mrb[8].mxu0 }
 0x46d   : > { %v1442_v20 = vpop.f32.mrb[9].mxu0 }
 0x46e   : > { %v656_v21 = vpop.f32.mrb[10].mxu0 }
 0x46f   : > { %v660_v22 = vpack.c.bf16 %v656_v21, %v653_v17  ;;  %v1443_v23 = vpop.f32.mrb[11].mxu0 }
 0x470   : > { %v1355_v23 = vld [vmem:[%s1871_s28 + $0x1c] sm:$0xf] }
 0x471   : > { %1447 = vmatmul.mubr.msk.bf16.vlgmr.msra.gmra.mrb[8].mxu1 %vm409_vm3, %v660_v22 }
 0x472   : > { %1457 = vmatpush3.bf16.xpose.msra.mxu1 %v773_v24  ;;  %1458 = vmatprep.mubr.msk.bf16.mxu1 %vm1717_vm1, %v1716_v2  ;;  %v1024_v24 = vsel %vm483_vm4, %v1355_v23, 0 }
 0x473   : > { %1468 = vmatprep.subr.bf16.mxu1 %v1716_v2 }
 0x479   : > { %1459 = vmatmul.mubr.msk.bf16.vlgmr.msra.gmra.mrb[12].mxu1 %vm409_vm3, %v768_v25  ;;  %v1360_v25 = vld [vmem:[%s1916_s27 + $0xc] sm:$0xf] }
 0x47a   : > { %1470 = vmatprep.mubr.msk.bf16.mxu1 %vm1717_vm1, %v1716_v2  ;;  %1469 = vmatpush3.bf16.msra.mxu1 %v895_v0 }
 0x47b   : > { %1480 = vmatprep.subr.bf16.mxu1 %v1716_v2 }
 0x4d1   : > { %v752_v26 = vpop.f32.mrb[12].mxu0 }
 0x4d2   : > { %v1454_v27 = vpop.f32.mrb[13].mxu0 }
 0x4d3   : > { %v755_v28 = vpop.f32.mrb[14].mxu0 }
 0x4d4   : > { %v1455_v29 = vpop.f32.mrb[15].mxu0 }
 0x544   : > { %v705_v30 = vpop.f32.mrb[8].mxu1 }
 0x545   : > { %v1939_v31 = vadd.f32 %v752_v26, %v705_v30  ;;  %v1448_v32 = vpop.f32.mrb[9].mxu1  ;;  %v1076_v26 = vsel %vm483_vm4, %v1360_v25, 0 }
 0x546   : > { %v708_v33 = vpop.f32.mrb[10].mxu1 }
 0x547   : > { %v1941_v34 = vadd.f32 %v755_v28, %v708_v33  ;;  %v1449_v35 = vpop.f32.mrb[11].mxu1 }
 0x54c   : > { %v809_v36 = vpop.f32.mrb[12].mxu1 }
 0x54d   : > { %v1460_v37 = vpop.f32.mrb[13].mxu1  ;;  %v816_v38 = vsel %vm409_vm3, %v809_v36, -inf }
 0x54e   : > { %817 = vmax.xlane.f32.xlu0 %v816_v38  ;;  %v812_v39 = vpop.f32.mrb[14].mxu1 }
 0x54f   : > { %v1461_v40 = vpop.f32.mrb[15].mxu1  ;;  %v819_v41 = vsel %vm409_vm3, %v812_v39, -inf }
 0x552   : > { %820 = vmax.xlane.f32.xlu0 %v819_v41 }
 0x5db   : > { %v818_v42 = vpop.xlane.xlu0 %817 }
 0x5dc   : > { %v822_v43 = vsub.f32 %v809_v36, %v818_v42 }
 0x5de   : > { %v824_v44 = vmul.f32 1.442695, %v822_v43 }
 0x5df   : > { %v821_v45 = vpop.xlane.xlu0 %820 }
 0x5e0   : > { %1589 = vpow2.f32 %v824_v44  ;;  %v823_v46 = vsub.f32 %v812_v39, %v821_v45 }
 0x5e2   : > { %v826_v47 = vmul.f32 1.442695, %v823_v46  ;;  %v1362_v46 = vld [vmem:[%s1121_s14] ss:$0 sm:$0xff] }
 0x5e4   : > { %1591 = vpow2.f32 %v826_v47 }
 0x5ea   : > { %v1590_v48 = vpop.eup %1589 }
 0x5eb   : > { %v828_v49 = vsel %vm409_vm3, %v1590_v48, 0.0 }
 0x5ec   : > { %829 = vadd.xlane.f32.xlu0 %v828_v49 }
 0x5ee   : > { %v1592_v50 = vpop.eup %1591 }
 0x5ef   : > { %v831_v51 = vsel %vm409_vm3, %v1592_v50, 0.0 }
 0x5f0   : > { %832 = vadd.xlane.f32.xlu1 %v831_v51 }
 0x602   : > { %948 = vrot.lane.b32.xlu0 %v1881_v18, %s1720_s24 }
 0x679   : > { %v830_v54 = vpop.xlane.xlu0 %829 }
 0x67a   : > { %1593 = vrcp.f32 %v830_v54 }
 0x67d   : > { %v833_v55 = vpop.xlane.xlu1 %832  ;;  %v949_v18 = vpop.permute.xlu0 %948 }
 0x67e   : > { %1595 = vrcp.f32 %v833_v55 }
 0x684   : > { %v1594_v56 = vpop.eup %1593 }
 0x685   : > { %v835_v59 = vmul.f32 %v1594_v56, %v1590_v48 }
 0x688   : > { %v1596_v57 = vpop.eup %1595 }
 0x689   : > { %v837_v60 = vmul.f32 %v1596_v57, %v1592_v50 }
 0x68b   : > { %v838_v61 = vpack.c.bf16 %v837_v60, %v835_v59 }
 0x68d   : > { %1465 = vmatmul.mubr.msk.bf16.vlgmr.msra.gmra.mrb[16].mxu0 %vm409_vm3, %v838_v61 }
 0x68e   : > { %1475 = vmatpush3.bf16.xpose.msra.mxu0 %v954_v62  ;;  %1476 = vmatprep.mubr.msk.bf16.mxu0 %vm1717_vm1, %v1716_v2 }
 0x68f   : > { %1486 = vmatprep.subr.bf16.mxu0 %v1716_v2 }
 0x695   : > { %1477 = vmatmul.mubr.msk.bf16.vlgmr.msra.gmra.mrb[20].mxu0 %vm409_vm3, %v949_v18 }
 0x696   : > { %1488 = vmatprep.mubr.msk.bf16.mxu0 %vm1717_vm1, %v1716_v2  ;;  %1487 = vmatpush3.bf16.msra.mxu0 %v1076_v26 }
 0x760   : > { %v879_v1 = vpop.f32.mrb[16].mxu0 }
 0x761   : > { %v1466_v3 = vpop.f32.mrb[17].mxu0 }
 0x762   : > { %v882_v4 = vpop.f32.mrb[18].mxu0 }
 0x763   : > { %v886_v5 = vpack.c.bf16 %v882_v4, %v879_v1  ;;  %v1467_v6 = vpop.f32.mrb[19].mxu0 }
 0x765   : > { %1471 = vmatmul.mubr.msk.bf16.vlgmr.msra.gmra.mrb[16].mxu1 %vm409_vm3, %v886_v5 }
 0x766   : > { %1482 = vmatprep.mubr.msk.bf16.mxu1 %vm1717_vm1, %v1716_v2  ;;  %1481 = vmatpush3.bf16.msra.mxu1 %v1024_v24 }
 0x768   : > { %v990_v7 = vpop.f32.mrb[20].mxu0 }
 0x769   : > { %v1478_v8 = vpop.f32.mrb[21].mxu0  ;;  %v997_v9 = vsel %vm409_vm3, %v990_v7, -inf }
 0x76a   : > { %998 = vmax.xlane.f32.xlu0 %v997_v9  ;;  %v993_v10 = vpop.f32.mrb[22].mxu0 }
 0x76b   : > { %v1479_v11 = vpop.f32.mrb[23].mxu0  ;;  %v1000_v12 = vsel %vm409_vm3, %v993_v10, -inf }
 0x76c   : > { %1001 = vmax.xlane.f32.xlu1 %v1000_v12 }
 0x7f7   : > { %v999_v13 = vpop.xlane.xlu0 %998 }
 0x7f8   : > { %v1003_v14 = vsub.f32 %v990_v7, %v999_v13 }
 0x7f9   : > { %v1002_v15 = vpop.xlane.xlu1 %1001 }
 0x7fa   : > { %v1005_v16 = vmul.f32 1.442695, %v1003_v14  ;;  %v1004_v17 = vsub.f32 %v993_v10, %v1002_v15 }
 0x7fc   : > { %1597 = vpow2.f32 %v1005_v16  ;;  %v1007_v19 = vmul.f32 1.442695, %v1004_v17 }
 0x7fe   : > { %1599 = vpow2.f32 %v1007_v19 }
 0x806   : > { %v1598_v2 = vpop.eup %1597 }
 0x807   : > { %v1009_v20 = vsel %vm409_vm3, %v1598_v2, 0.0 }
 0x808   : > { %v1600_v21 = vpop.eup %1599  ;;  %1010 = vadd.xlane.f32.xlu1 %v1009_v20 }
 0x809   : > { %v1012_v22 = vsel %vm409_vm3, %v1600_v21, 0.0 }
 0x80c   : > { %1013 = vadd.xlane.f32.xlu1 %v1012_v22 }
 0x838   : > { %v931_v27 = vpop.f32.mrb[16].mxu1 }
 0x839   : > { %v938_v28 = vadd.f32 %v931_v27, %v1939_v31  ;;  %v1472_v29 = vpop.f32.mrb[17].mxu1 }
 0x83a   : > { %v934_v30 = vpop.f32.mrb[18].mxu1 }
 0x83b   : > { %v939_v32 = vadd.f32 %v934_v30, %v1941_v34  ;;  %v1473_v33 = vpop.f32.mrb[19].mxu1 }
 0x895   : > { %v1011_v35 = vpop.xlane.xlu1 %1010 }
 0x896   : > { %1601 = vrcp.f32 %v1011_v35 }
 0x899   : > { %v1014_v36 = vpop.xlane.xlu1 %1013 }
 0x89a   : > { %1603 = vrcp.f32 %v1014_v36 }
 0x8a0   : > { %v1602_v37 = vpop.eup %1601 }
 0x8a1   : > { %v1016_v39 = vmul.f32 %v1602_v37, %v1598_v2 }
 0x8a4   : > { %v1604_v38 = vpop.eup %1603 }
 0x8a5   : > { %v1018_v40 = vmul.f32 %v1604_v38, %v1600_v21 }
 0x8a7   : > { %v1019_v41 = vpack.c.bf16 %v1018_v40, %v1016_v39 }
 0x8a9   : > { %1483 = vmatmul.mubr.msk.bf16.vlgmr.msra.gmra.mrb[20].mxu1 %vm409_vm3, %v1019_v41 }
 0x97c   : > { %v1060_v42 = vpop.f32.mrb[20].mxu1 }
 0x97d   : > { %v1484_v43 = vpop.f32.mrb[21].mxu1 }
 0x97e   : > { %v1063_v31 = vpop.f32.mrb[22].mxu1 }
 0x97f   : > { %v1067_v44 = vpack.c.bf16 %v1063_v31, %v1060_v42  ;;  %v1485_v45 = vpop.f32.mrb[23].mxu1 }
 0x981   : > { %1489 = vmatmul.mubr.msk.bf16.vlgmr.msra.gmra.mrb[24].mxu0 %vm409_vm3, %v1067_v44 }
 0xa54   : > { %v1112_v34 = vpop.f32.mrb[24].mxu0 }
 0xa55   : > { %v1119_v47 = vadd.f32 %v1112_v34, %v938_v28  ;;  %v1490_v48 = vpop.f32.mrb[25].mxu0  ;;  %1136 = sbr.rel (%p1363_p5) target bundleno = 2652 (0xa5c), region = 52 }
 0xa56   : > { %v1115_v49 = vpop.f32.mrb[26].mxu0 }
 0xa57   : > { %v1129_v50 = vadd.f32 %v1362_v46, %v1119_v47  ;;  %v1120_v51 = vadd.f32 %v1115_v49, %v939_v32  ;;  %v1491_v52 = vpop.f32.mrb[27].mxu0 }
 0xa59   : > { %1131 = vst.msk [vmem:[#allocation2] sm:$0xff] %vm355_vm2, %v1129_v50  ;;  %v1130_v53 = vadd.f32 %v1362_v46, %v1120_v51  ;;  %1137 = vst.msk [vmem:[%s1849_s16] sm:$0xff] (!%p1363_p5), %vm355_vm2, %v1129_v50 }
 0xa5b   : > { %1132 = vst.msk [vmem:[#allocation2 + $0x8] sm:$0xff] %vm355_vm2, %v1130_v53  ;;  %1138 = vst.msk [vmem:[%s1849_s16 + $0x8] sm:$0xff] (!%p1363_p5), %vm355_vm2, %v1130_v53 }
 0xa5c PF: > { %s1384_s19 = sshll.u32 %s1701_s9, 8  ;;  %s1155_s23 = sshll.u32 %s1849_s16, 4  ;;  %s1996_s23 = int_to_ptr.vmem [resolvable:$true] %s1155_s23 }
 0xa5d   : > { %s1993_s26 = scalar_lea.hbm %s2059_s7, %s1384_s19  ;;  %s2000_s8 = scalar_lea.sflag [#allocation6], %s296_s22 }
 0xa5e   : > { %s1617_s27 = scalar_lea.vmem %s1996_s23, 256  ;;  %s1721_s9 = smov [#allocation5]  }
 0xa5f   : > { %p1618_p6 = scmp.ne.s32.totalorder %s1996_s23, %s1617_s27  ;;  %s1621_s24 = sshll.u32 %s1721_s9, 4  ;;  %s1622_s24 = int_to_ptr.vmem [resolvable:$false] %s1621_s24 }
 0xa60   : > { %s1623_s28 = scalar_lea.vmem %s1622_s24, 512  ;;  %p1624_p10 = scmp.lt.s32.totalorder %s1996_s23, %s1622_s24 }
 0xa61   : > { %p1619_p7 = pnand %p1618_p6, %p1816_p8  ;;  %p1625_p11 = scmp.lt.s32.totalorder %s1623_s28, %s1617_s27 }
 0xa63   : > { %p1620_p9 = pneg %p1619_p7  ;;  %p1626_p12 = por %p1625_p11, %p1624_p10 }
 0xa65   : > { %p1627_p13 = pnand %p1626_p12, %p1620_p9 }
 0xa67   : > { %1630 = shalt.err (!%p1627_p13)
}
 0xa68   : > { %s1631_s16 = scalar_lea.hbm %s1993_s26, 256  ;;  %s1635_s14 = scalar_lea.hbm %s2059_s7, 512 }
 0xa69   : > { %p1632_p1 = scmp.ne.s32.totalorder %s1993_s26, %s1631_s16  ;;  %p1636_p4 = scmp.lt.u32.totalorder %s1993_s26, %s2059_s7 }
 0xa6a   : > { %p1637_p5 = scmp.lt.u32.totalorder %s1635_s14, %s1631_s16  ;;  %p1639_p7 = scmp.lt.u32.totalorder %s1631_s16, %s1993_s26 }
 0xa6b   : > { %p1633_p2 = pnand %p1632_p1, %p1816_p8 }
 0xa6c   : > { %p1638_p6 = por %p1637_p5, %p1636_p4 }
 0xa6d   : > { %p1634_p3 = pneg %p1633_p2 }
 0xa6e   : > { %p1640_p9 = por %p1639_p7, %p1638_p6 }
 0xa70   : > { %p1641_p10 = pnand %p1640_p9, %p1634_p3 }
 0xa72   : > { %1644 = shalt.err (!%p1641_p10)
}
 0xa73   : > { %s1722_s25 = smov 128   ;;  %s1723_s27 = smov 8  }
 0xa74   : > { %1492 = dma.vmem_to_hbm [thread:$0]  (%p1816_p8), %s1996_s23, 256, %s1993_s26, %s2000_s8, %s1722_s25, %s1722_s25, %s1723_s27  }
 0xa75 PF: > { %p1498_p11 = scmp.ge.s32.totalorder %s1713_s12, 2  ;;  %s1170_s9 = sand.u32 1, %s1685_s29  }
 0xa76   : > { %s1171_s24 = scalar_lea.sflag [#allocation6], %s1170_s9 }
 0xa77   : > { %p1495_p12 = pnand %p1498_p11, %p1826_p0 }
 0xa79   : > { %1680 = dma.done.wait (!%p1495_p12), %s1171_s24, 256  }
 0xa7a   : > { %1682 = vsyncadd (!%p1495_p12), %s1171_s24, 4294967040  ;;  %s26_s12 = sadd.s32 1, %s1713_s12   ;;  %s2064_s17 = sld [smem:[#allocation9_spill]] }
 0xa7b   : > { %p23_p13 = scmp.ge.s32.totalorder %s26_s12, 6   ;;  %s2065_s29 = smov %s1689_s30 }
 0xa7c   : > { %s2066_s30 = smov %s1693_s0  ;;  %s2067_s0 = smov %s1834_s21 }
 0xa7d   : > { %s2068_s8 = smov %s1705_s10  ;;  %s2069_s9 = smov %s1709_s11 }
 0xa7e   : > { %s2070_s10 = smov %s2073_s15  ;;  %25 = sbr.rel (!%p23_p13) target bundleno = 20 (0x14), region = 105 }
 0xa80   : > { %s2071_s11 = smov %s2064_s17 }
 0xa85   :  { %1176 = vsyncpa [#allocation6], 1 }
 0xa86   :  { %1178 = vsyncpa [#allocation6 + $0x1], 1 }

</bundles_post_ra>
